<compile_context>
chip_gen: v7x
topology: tpu7x:2x2x1
jax: 0.10.0
libtpu: 0.0.40
codegen_flags: <defaults>
</compile_context>

<pallas_src>
import jax
import jax.numpy as jnp
from jax import lax
from jax.experimental import pallas as pl
from jax.experimental.pallas import tpu as pltpu

D_IN, H, D_OUT = 28 * 28, 64, 10          # original (PyTorch) dims
D_IN_PAD, H_PAD, D_OUT_PAD = 896, 128, 128  # lane-dense padded dims


def mlp_kernel(x_ref, w1_ref, b1_ref, w2_ref, b2_ref,
               w3_ref, b3_ref, w4_ref, b4_ref, o_ref):
    # x tile: (TB, 896) bf16. Weights bf16, biases f32, accumulation f32.
    x = x_ref[...]
    h = jnp.tanh(jnp.dot(x, w1_ref[...],
                         preferred_element_type=jnp.float32) + b1_ref[...])
    h = jnp.tanh(jnp.dot(h.astype(jnp.bfloat16), w2_ref[...],
                         preferred_element_type=jnp.float32) + b2_ref[...])
    h = jnp.tanh(jnp.dot(h.astype(jnp.bfloat16), w3_ref[...],
                         preferred_element_type=jnp.float32) + b3_ref[...])
    logits = jnp.dot(h.astype(jnp.bfloat16), w4_ref[...],
                     preferred_element_type=jnp.float32) + b4_ref[...]

    # Padded logit columns (10..127) must not contribute to the softmax sum.
    col = lax.broadcasted_iota(jnp.int32, logits.shape, 1)
    logits = jnp.where(col < D_OUT, logits, jnp.float32(-1e30))

    # log_softmax along the feature axis (f32, max-shifted).
    m = jnp.max(logits, axis=-1, keepdims=True)
    shifted = logits - m
    lse = jnp.log(jnp.sum(jnp.exp(shifted), axis=-1, keepdims=True))
    o_ref[...] = shifted - lse


def _round_up(n, m):
    return (n + m - 1) // m * m


def pad_params(params):
    """Zero-pad to lane-dense shapes and cast weights to bf16.

    Zero padding is exact: padded hidden units get tanh(0)=0 and feed zero
    weights downstream; padded fc1 K columns multiply zero-padded x features.
    """
    def pw(w, rows, cols):
        return jnp.pad(w, ((0, rows - w.shape[0]),
                           (0, cols - w.shape[1]))).astype(jnp.bfloat16)

    def pb(b, cols):
        b2 = b.reshape(1, -1)
        return jnp.pad(b2, ((0, 0), (0, cols - b2.shape[1]))).astype(jnp.float32)

    return dict(
        w1=pw(params["w1"], D_IN_PAD, H_PAD), b1=pb(params["b1"], H_PAD),
        w2=pw(params["w2"], H_PAD, H_PAD),    b2=pb(params["b2"], H_PAD),
        w3=pw(params["w3"], H_PAD, H_PAD),    b3=pb(params["b3"], H_PAD),
        w4=pw(params["w4"], H_PAD, D_OUT_PAD), b4=pb(params["b4"], D_OUT_PAD),
    )


def net_forward(x, params, *, tb=256):
    """x: (B, 784) float32. params: dict of unpadded f32 weights/biases."""
    B = x.shape[0]
    TB = min(tb, _round_up(max(B, 1), 16))   # bf16-friendly sublane multiple
    B_pad = _round_up(B, TB)

    pp = pad_params(params)
    xp = jnp.pad(x, ((0, B_pad - B), (0, D_IN_PAD - D_IN))).astype(jnp.bfloat16)

    grid = (B_pad // TB,)
    const = lambda a: pl.BlockSpec(a.shape, lambda i: (0, 0))

    param_bytes = sum(int(v.size) * v.dtype.itemsize for v in pp.values())
    cost = pl.CostEstimate(
        flops=2 * B_pad * (D_IN_PAD * H_PAD + 2 * H_PAD * H_PAD
                           + H_PAD * D_OUT_PAD),
        transcendentals=B_pad * (3 * H_PAD + D_OUT_PAD + 1),
        bytes_accessed=int(xp.size) * 2 + B_pad * D_OUT_PAD * 4 + param_bytes,
    )

    out = pl.pallas_call(
        mlp_kernel,
        out_shape=jax.ShapeDtypeStruct((B_pad, D_OUT_PAD), jnp.float32),
        grid=grid,
        in_specs=[pl.BlockSpec((TB, D_IN_PAD), lambda i: (i, 0)),
                  const(pp["w1"]), const(pp["b1"]),
                  const(pp["w2"]), const(pp["b2"]),
                  const(pp["w3"]), const(pp["b3"]),
                  const(pp["w4"]), const(pp["b4"])],
        out_specs=pl.BlockSpec((TB, D_OUT_PAD), lambda i: (i, 0)),
        compiler_params=pltpu.CompilerParams(
            dimension_semantics=("parallel",),
            vmem_limit_bytes=32 << 20),
        cost_estimate=cost,
    )(xp, pp["w1"], pp["b1"], pp["w2"], pp["b2"],
      pp["w3"], pp["b3"], pp["w4"], pp["b4"])

    return out[:B, :D_OUT]


def init_params(key):
    """PyTorch nn.Linear default init: U(-1/sqrt(fan_in), 1/sqrt(fan_in))."""
    dims = [(D_IN, H), (H, H), (H, H), (H, D_OUT)]
    params = {}
    keys = jax.random.split(key, 2 * len(dims))
    for i, (fan_in, fan_out) in enumerate(dims):
        bound = 1.0 / jnp.sqrt(jnp.float32(fan_in))
        params[f"w{i + 1}"] = jax.random.uniform(
            keys[2 * i], (fan_in, fan_out), jnp.float32, -bound, bound)
        params[f"b{i + 1}"] = jax.random.uniform(
            keys[2 * i + 1], (fan_out,), jnp.float32, -bound, bound)
    return params


def reference_forward(x, params):
    h = jnp.tanh(x @ params["w1"] + params["b1"])
    h = jnp.tanh(h @ params["w2"] + params["b2"])
    h = jnp.tanh(h @ params["w3"] + params["b3"])
    logits = h @ params["w4"] + params["b4"]
    return jax.nn.log_softmax(logits, axis=1)


if __name__ == "__main__":
    key = jax.random.PRNGKey(0)
    pkey, xkey = jax.random.split(key)
    params = init_params(pkey)

    B = 8
    x = jax.random.normal(xkey, (B, D_IN), dtype=jnp.float32)

    out = net_forward(x, params)
    out = jax.block_until_ready(out)

    ref = reference_forward(x, params)
    assert out.shape == (B, D_OUT)
    # bf16 matmul operands with f32 accumulation -> loosened tolerance vs f32 ref.
    assert jnp.allclose(out, ref, atol=5e-2, rtol=5e-2)

    print("KERNEL_OK")
</pallas_src>

<mosaic_0001>
module attributes {stable_mosaic.version = 11 : i64} {
  func.func @mlp_kernel(%arg0: i32, %arg1: memref<16x896xbf16, #tpu.memory_space<vmem>>, %arg2: memref<896x128xbf16, #tpu.memory_space<vmem>>, %arg3: memref<1x128xf32, #tpu.memory_space<vmem>>, %arg4: memref<128x128xbf16, #tpu.memory_space<vmem>>, %arg5: memref<1x128xf32, #tpu.memory_space<vmem>>, %arg6: memref<128x128xbf16, #tpu.memory_space<vmem>>, %arg7: memref<1x128xf32, #tpu.memory_space<vmem>>, %arg8: memref<128x128xbf16, #tpu.memory_space<vmem>>, %arg9: memref<1x128xf32, #tpu.memory_space<vmem>>, %arg10: memref<16x128xf32, #tpu.memory_space<vmem>>) attributes {dimension_semantics = [#tpu.dimension_semantics<parallel>], iteration_bounds = array<i64: 1>, scalar_prefetch = 0 : i64, scratch_operands = 0 : i64, tpu.core_type = #tpu.core_type<tc>, window_params = [{transform_indices = @transform_0, window_bounds = array<i64: 16, 896>}, {pipeline_mode = #tpu.pipeline_mode<synchronous>, transform_indices = @transform_1, window_bounds = array<i64: 896, 128>}, {pipeline_mode = #tpu.pipeline_mode<synchronous>, transform_indices = @transform_2, window_bounds = array<i64: 1, 128>}, {pipeline_mode = #tpu.pipeline_mode<synchronous>, transform_indices = @transform_3, window_bounds = array<i64: 128, 128>}, {pipeline_mode = #tpu.pipeline_mode<synchronous>, transform_indices = @transform_4, window_bounds = array<i64: 1, 128>}, {pipeline_mode = #tpu.pipeline_mode<synchronous>, transform_indices = @transform_5, window_bounds = array<i64: 128, 128>}, {pipeline_mode = #tpu.pipeline_mode<synchronous>, transform_indices = @transform_6, window_bounds = array<i64: 1, 128>}, {pipeline_mode = #tpu.pipeline_mode<synchronous>, transform_indices = @transform_7, window_bounds = array<i64: 128, 128>}, {pipeline_mode = #tpu.pipeline_mode<synchronous>, transform_indices = @transform_8, window_bounds = array<i64: 1, 128>}, {transform_indices = @transform_9, window_bounds = array<i64: 16, 128>}]} {
    %c0 = arith.constant 0 : index
    %c0_0 = arith.constant 0 : index
    %0 = vector.load %arg1[%c0, %c0_0] : memref<16x896xbf16, #tpu.memory_space<vmem>>, vector<16x896xbf16>
    %c0_1 = arith.constant 0 : index
    %c0_2 = arith.constant 0 : index
    %1 = vector.load %arg2[%c0_1, %c0_2] : memref<896x128xbf16, #tpu.memory_space<vmem>>, vector<896x128xbf16>
    %cst = arith.constant dense<0.000000e+00> : vector<16x128xf32>
    %2 = tpu.matmul %0, %1, %cst {dimension_numbers = #tpu.dot_dimension_numbers<[1], [0], [0], [1], [0, 0, 1, 1], [], []>} : vector<16x896xbf16>, vector<896x128xbf16>, vector<16x128xf32> -> vector<16x128xf32>
    %c0_3 = arith.constant 0 : index
    %c0_4 = arith.constant 0 : index
    %3 = vector.load %arg3[%c0_3, %c0_4] : memref<1x128xf32, #tpu.memory_space<vmem>>, vector<1x128xf32>
    %4 = vector.broadcast %3 : vector<1x128xf32> to vector<16x128xf32>
    %5 = arith.addf %2, %4 : vector<16x128xf32>
    %6 = math.tanh %5 : vector<16x128xf32>
    %7 = arith.truncf %6 : vector<16x128xf32> to vector<16x128xbf16>
    %c0_5 = arith.constant 0 : index
    %c0_6 = arith.constant 0 : index
    %8 = vector.load %arg4[%c0_5, %c0_6] : memref<128x128xbf16, #tpu.memory_space<vmem>>, vector<128x128xbf16>
    %cst_7 = arith.constant dense<0.000000e+00> : vector<16x128xf32>
    %9 = tpu.matmul %7, %8, %cst_7 {dimension_numbers = #tpu.dot_dimension_numbers<[1], [0], [0], [1], [0, 0, 1, 1], [], []>} : vector<16x128xbf16>, vector<128x128xbf16>, vector<16x128xf32> -> vector<16x128xf32>
    %c0_8 = arith.constant 0 : index
    %c0_9 = arith.constant 0 : index
    %10 = vector.load %arg5[%c0_8, %c0_9] : memref<1x128xf32, #tpu.memory_space<vmem>>, vector<1x128xf32>
    %11 = vector.broadcast %10 : vector<1x128xf32> to vector<16x128xf32>
    %12 = arith.addf %9, %11 : vector<16x128xf32>
    %13 = math.tanh %12 : vector<16x128xf32>
    %14 = arith.truncf %13 : vector<16x128xf32> to vector<16x128xbf16>
    %c0_10 = arith.constant 0 : index
    %c0_11 = arith.constant 0 : index
    %15 = vector.load %arg6[%c0_10, %c0_11] : memref<128x128xbf16, #tpu.memory_space<vmem>>, vector<128x128xbf16>
    %cst_12 = arith.constant dense<0.000000e+00> : vector<16x128xf32>
    %16 = tpu.matmul %14, %15, %cst_12 {dimension_numbers = #tpu.dot_dimension_numbers<[1], [0], [0], [1], [0, 0, 1, 1], [], []>} : vector<16x128xbf16>, vector<128x128xbf16>, vector<16x128xf32> -> vector<16x128xf32>
    %c0_13 = arith.constant 0 : index
    %c0_14 = arith.constant 0 : index
    %17 = vector.load %arg7[%c0_13, %c0_14] : memref<1x128xf32, #tpu.memory_space<vmem>>, vector<1x128xf32>
    %18 = vector.broadcast %17 : vector<1x128xf32> to vector<16x128xf32>
    %19 = arith.addf %16, %18 : vector<16x128xf32>
    %20 = math.tanh %19 : vector<16x128xf32>
    %21 = arith.truncf %20 : vector<16x128xf32> to vector<16x128xbf16>
    %c0_15 = arith.constant 0 : index
    %c0_16 = arith.constant 0 : index
    %22 = vector.load %arg8[%c0_15, %c0_16] : memref<128x128xbf16, #tpu.memory_space<vmem>>, vector<128x128xbf16>
    %cst_17 = arith.constant dense<0.000000e+00> : vector<16x128xf32>
    %23 = tpu.matmul %21, %22, %cst_17 {dimension_numbers = #tpu.dot_dimension_numbers<[1], [0], [0], [1], [0, 0, 1, 1], [], []>} : vector<16x128xbf16>, vector<128x128xbf16>, vector<16x128xf32> -> vector<16x128xf32>
    %c0_18 = arith.constant 0 : index
    %c0_19 = arith.constant 0 : index
    %24 = vector.load %arg9[%c0_18, %c0_19] : memref<1x128xf32, #tpu.memory_space<vmem>>, vector<1x128xf32>
    %25 = vector.broadcast %24 : vector<1x128xf32> to vector<16x128xf32>
    %26 = arith.addf %23, %25 : vector<16x128xf32>
    %27 = tpu.iota {dimensions = array<i32: 1>} : vector<16x128xi32>
    %c10_i32 = arith.constant 10 : i32
    %28 = vector.broadcast %c10_i32 : i32 to vector<16x128xi32>
    %29 = arith.cmpi slt, %27, %28 : vector<16x128xi32>
    %cst_20 = arith.constant -1.000000e+30 : f32
    %30 = vector.broadcast %cst_20 : f32 to vector<16x128xf32>
    %31 = arith.select %29, %26, %30 : vector<16x128xi1>, vector<16x128xf32>
    %cst_21 = arith.constant dense<0xFF800000> : vector<16xf32>
    %32 = vector.multi_reduction <maximumf>, %31, %cst_21 [1] : vector<16x128xf32> to vector<16xf32>
    %33 = vector.shape_cast %32 : vector<16xf32> to vector<16x1xf32>
    %34 = vector.broadcast %33 : vector<16x1xf32> to vector<16x128xf32>
    %35 = arith.subf %31, %34 : vector<16x128xf32>
    %36 = math.exp %35 : vector<16x128xf32>
    %cst_22 = arith.constant dense<0.000000e+00> : vector<16xf32>
    %37 = vector.multi_reduction <add>, %36, %cst_22 [1] : vector<16x128xf32> to vector<16xf32>
    %38 = vector.shape_cast %37 : vector<16xf32> to vector<16x1xf32>
    %39 = math.log %38 : vector<16x1xf32>
    %40 = vector.broadcast %39 : vector<16x1xf32> to vector<16x128xf32>
    %41 = arith.subf %35, %40 : vector<16x128xf32>
    %c0_23 = arith.constant 0 : index
    %c0_24 = arith.constant 0 : index
    %42 = vector.load %arg10[%c0_23, %c0_24] : memref<16x128xf32, #tpu.memory_space<vmem>>, vector<16x128xf32>
    tpu.vector_store %arg10[%c0_23, %c0_24], %41 {strides = array<i32>} : memref<16x128xf32, #tpu.memory_space<vmem>>, vector<16x128xf32>,
    return
  }
  func.func @transform_0(%arg0: i32) -> (i32, i32) {
    %c0_i32 = arith.constant 0 : i32
    %c0_i32_0 = arith.constant 0 : i32
    return %arg0, %c0_i32 : i32, i32
  }
  func.func @transform_1(%arg0: i32) -> (i32, i32) {
    %c0_i32 = arith.constant 0 : i32
    %c0_i32_0 = arith.constant 0 : i32
    %c0_i32_1 = arith.constant 0 : i32
    return %c0_i32, %c0_i32_0 : i32, i32
  }
  func.func @transform_2(%arg0: i32) -> (i32, i32) {
    %c0_i32 = arith.constant 0 : i32
    %c0_i32_0 = arith.constant 0 : i32
    %c0_i32_1 = arith.constant 0 : i32
    return %c0_i32, %c0_i32_0 : i32, i32
  }
  func.func @transform_3(%arg0: i32) -> (i32, i32) {
    %c0_i32 = arith.constant 0 : i32
    %c0_i32_0 = arith.constant 0 : i32
    %c0_i32_1 = arith.constant 0 : i32
    return %c0_i32, %c0_i32_0 : i32, i32
  }
  func.func @transform_4(%arg0: i32) -> (i32, i32) {
    %c0_i32 = arith.constant 0 : i32
    %c0_i32_0 = arith.constant 0 : i32
    %c0_i32_1 = arith.constant 0 : i32
    return %c0_i32, %c0_i32_0 : i32, i32
  }
  func.func @transform_5(%arg0: i32) -> (i32, i32) {
    %c0_i32 = arith.constant 0 : i32
    %c0_i32_0 = arith.constant 0 : i32
    %c0_i32_1 = arith.constant 0 : i32
    return %c0_i32, %c0_i32_0 : i32, i32
  }
  func.func @transform_6(%arg0: i32) -> (i32, i32) {
    %c0_i32 = arith.constant 0 : i32
    %c0_i32_0 = arith.constant 0 : i32
    %c0_i32_1 = arith.constant 0 : i32
    return %c0_i32, %c0_i32_0 : i32, i32
  }
  func.func @transform_7(%arg0: i32) -> (i32, i32) {
    %c0_i32 = arith.constant 0 : i32
    %c0_i32_0 = arith.constant 0 : i32
    %c0_i32_1 = arith.constant 0 : i32
    return %c0_i32, %c0_i32_0 : i32, i32
  }
  func.func @transform_8(%arg0: i32) -> (i32, i32) {
    %c0_i32 = arith.constant 0 : i32
    %c0_i32_0 = arith.constant 0 : i32
    %c0_i32_1 = arith.constant 0 : i32
    return %c0_i32, %c0_i32_0 : i32, i32
  }
  func.func @transform_9(%arg0: i32) -> (i32, i32) {
    %c0_i32 = arith.constant 0 : i32
    %c0_i32_0 = arith.constant 0 : i32
    return %arg0, %c0_i32 : i32, i32
  }
}

</mosaic_0001>

<bundles_post_ra>
// kernel: tpu_custom_call.1
= control target key start
LH: loop header
LB: loop body
LE: loop exit
PB: predicated region body
PF: predicated region fallthrough
CT: control target
= control target key end

     0   :  { %14 = vsyncpa [#allocation3], 0  ;;  %s1893_s0 = inlined_call_operand.hbm [shape: bf16[16,896], index: 0, kind: input, shape index: {}]   ;;  %s1894_s1 = inlined_call_operand.hbm [shape: bf16[896,128], index: 1, kind: input, shape index: {}]   ;;  %s1895_s2 = inlined_call_operand.vmem [shape: f32[1,128], index: 2, kind: input, shape index: {}]   ;;  %s1896_s3 = inlined_call_operand.hbm [shape: bf16[128,128], index: 3, kind: input, shape index: {}]   ;;  %s1897_s4 = inlined_call_operand.vmem [shape: f32[1,128], index: 4, kind: input, shape index: {}]   ;;  %s1898_s5 = inlined_call_operand.hbm [shape: bf16[128,128], index: 5, kind: input, shape index: {}]   ;;  %s1899_s6 = inlined_call_operand.vmem [shape: f32[1,128], index: 6, kind: input, shape index: {}]   ;;  %s1900_s7 = inlined_call_operand.hbm [shape: bf16[128,128], index: 7, kind: input, shape index: {}]   ;;  %s1901_s8 = inlined_call_operand.vmem [shape: f32[1,128], index: 8, kind: input, shape index: {}]   ;;  %s1902_s9 = inlined_call_operand.hbm [shape: f32[16,128], index: 9, kind: output, shape index: {}]  }
   0x1   :  { %15 = vsyncpa [#allocation6], 0 }
   0x2   :  { %16 = vsyncpa [#allocation9], 0 }
   0x3   :  { %17 = vsyncpa [#allocation4], 0  ;;  %s1693_s30 = smov [#allocation5]   ;;  %s1553_s13 = scalar_lea.hbm %s1894_s1, 7168 }
   0x4   :  { %s35_s10 = sshll.u32 %s1693_s30, 4  ;;  %p1554_p0 = scmp.ne.s32.totalorder %s1894_s1, %s1553_s13  ;;  %s36_s10 = int_to_ptr.vmem [resolvable:$true] %s35_s10 }
   0x5   :  { %p1557_p1 = scmp.lt.u32.totalorder %s1553_s13, %s1894_s1 }
   0x7   :  { %p1559_p2 = pnand %p1557_p1, %p1554_p0 }
   0x9   :  { %1562 = shalt.err (!%p1559_p2)
}
   0xa   :  { %s1563_s18 = scalar_lea.vmem %s36_s10, 7168  ;;  %p1568_p4 = scmp.lt.s32.totalorder %s36_s10, %s36_s10 }
   0xb   :  { %p1564_p3 = scmp.ne.s32.totalorder %s36_s10, %s1563_s18  ;;  %p1569_p5 = scmp.lt.s32.totalorder %s1563_s18, %s1563_s18 }
   0xd   :  { %p1570_p6 = por %p1569_p5, %p1568_p4 }
   0xf   :  { %p1571_p7 = pnand %p1570_p6, %p1564_p3 }
  0x11   :  { %1574 = shalt.err (!%p1571_p7)
}
  0x12   :  { %s1694_s19 = smov 64   ;;  %s1695_s20 = smov 4  }
  0x13   :  { %41 = dma.hbm_to_vmem [thread:$0]  %s1894_s1, 7168, %s36_s10, [#allocation6], %s1694_s19, %s1694_s19, %s1695_s20  }
  0x14   :  { %s1696_s23 = smov [#allocation8]   ;;  %s1697_s25 = smov [#allocation2]  }
  0x15   :  { %s63_s24 = sshll.u32 %s1696_s23, 4  ;;  %s23_s26 = sshll.u32 %s1697_s25, 4  ;;  %s64_s24 = int_to_ptr.vmem [resolvable:$true] %s63_s24  ;;  %s24_s26 = int_to_ptr.vmem [resolvable:$true] %s23_s26 }
  0x16   :  { %s1575_s29 = scalar_lea.hbm %s1898_s5, 1024 }
  0x17   :  { %p1576_p8 = scmp.ne.s32.totalorder %s1898_s5, %s1575_s29  ;;  %p1579_p9 = scmp.lt.u32.totalorder %s1575_s29, %s1898_s5 }
  0x19   :  { %p1581_p10 = pnand %p1579_p9, %p1576_p8 }
  0x1b   :  { %1584 = shalt.err (!%p1581_p10)
}
  0x1c   :  { %s1585_s1 = scalar_lea.vmem %s64_s24, 1024  ;;  %p1590_p12 = scmp.lt.s32.totalorder %s64_s24, %s64_s24 }
  0x1d   :  { %p1586_p11 = scmp.ne.s32.totalorder %s64_s24, %s1585_s1  ;;  %p1591_p13 = scmp.lt.s32.totalorder %s1585_s1, %s1585_s1 }
  0x1f   :  { %p1592_p0 = por %p1591_p13, %p1590_p12 }
  0x21   :  { %p1593_p1 = pnand %p1592_p0, %p1586_p11 }
  0x23   :  { %1596 = shalt.err (!%p1593_p1)
}
  0x24   :  { %69 = dma.hbm_to_vmem [thread:$0]  %s1898_s5, 1024, %s64_s24, [#allocation9], %s1694_s19, %s1694_s19, %s1695_s20  }
  0x25   :  { %s1597_s17 = scalar_lea.hbm %s1893_s0, 896 }
  0x26   :  { %p1598_p2 = scmp.ne.s32.totalorder %s1893_s0, %s1597_s17  ;;  %p1601_p3 = scmp.lt.u32.totalorder %s1597_s17, %s1893_s0 }
  0x28   :  { %p1603_p4 = pnand %p1601_p3, %p1598_p2 }
  0x2a   :  { %1606 = shalt.err (!%p1603_p4)
}
  0x2b   :  { %s1607_s25 = scalar_lea.vmem %s24_s26, 896  ;;  %p1612_p6 = scmp.lt.s32.totalorder %s24_s26, %s24_s26 }
  0x2c   :  { %p1608_p5 = scmp.ne.s32.totalorder %s24_s26, %s1607_s25  ;;  %p1613_p7 = scmp.lt.s32.totalorder %s1607_s25, %s1607_s25 }
  0x2e   :  { %p1614_p8 = por %p1613_p7, %p1612_p6 }
  0x30   :  { %p1615_p9 = pnand %p1614_p8, %p1608_p5 }
  0x32   :  { %1618 = shalt.err (!%p1615_p9)
}
  0x33   :  { %s1698_s5 = smov 448   ;;  %s1699_s24 = smov 28  }
  0x34   :  { %29 = dma.hbm_to_vmem [thread:$0]  %s1893_s0, 896, %s24_s26, [#allocation3], %s1698_s5, %s1698_s5, %s1699_s24  }
  0x35   :  { %s1700_s29 = smov [#allocation7]   ;;  %s1701_s11 = smov [#allocation10]  }
  0x36   :  { %s49_s30 = sshll.u32 %s1700_s29, 4  ;;  %s77_s12 = sshll.u32 %s1701_s11, 4  ;;  %s50_s30 = int_to_ptr.vmem [resolvable:$true] %s49_s30  ;;  %s78_s12 = int_to_ptr.vmem [resolvable:$true] %s77_s12 }
  0x37   :  { %s1619_s10 = scalar_lea.hbm %s1896_s3, 1024 }
  0x38   :  { %p1620_p10 = scmp.ne.s32.totalorder %s1896_s3, %s1619_s10  ;;  %p1623_p11 = scmp.lt.u32.totalorder %s1619_s10, %s1896_s3 }
  0x3a   :  { %p1625_p12 = pnand %p1623_p11, %p1620_p10 }
  0x3c   :  { %1628 = shalt.err (!%p1625_p12)
}
  0x3d   :  { %s1629_s0 = scalar_lea.vmem %s50_s30, 1024  ;;  %p1634_p0 = scmp.lt.s32.totalorder %s50_s30, %s50_s30 }
  0x3e   :  { %p1630_p13 = scmp.ne.s32.totalorder %s50_s30, %s1629_s0  ;;  %p1635_p1 = scmp.lt.s32.totalorder %s1629_s0, %s1629_s0 }
  0x40   :  { %p1636_p2 = por %p1635_p1, %p1634_p0 }
  0x42   :  { %p1637_p3 = pnand %p1636_p2, %p1630_p13 }
  0x44   :  { %1640 = shalt.err (!%p1637_p3)
}
  0x45   :  { %55 = dma.hbm_to_vmem [thread:$0]  %s1896_s3, 1024, %s50_s30, [#allocation6], %s1694_s19, %s1694_s19, %s1695_s20  }
  0x46   :  { %s1641_s23 = scalar_lea.hbm %s1900_s7, 1024 }
  0x47   :  { %p1642_p4 = scmp.ne.s32.totalorder %s1900_s7, %s1641_s23  ;;  %p1645_p5 = scmp.lt.u32.totalorder %s1641_s23, %s1900_s7 }
  0x49   :  { %p1647_p6 = pnand %p1645_p5, %p1642_p4 }
  0x4b   :  { %1650 = shalt.err (!%p1647_p6)
}
  0x4c   :  { %s1651_s28 = scalar_lea.vmem %s78_s12, 1024  ;;  %p1656_p8 = scmp.lt.s32.totalorder %s78_s12, %s78_s12 }
  0x4d   :  { %p1652_p7 = scmp.ne.s32.totalorder %s78_s12, %s1651_s28  ;;  %p1657_p9 = scmp.lt.s32.totalorder %s1651_s28, %s1651_s28 }
  0x4f   :  { %p1658_p10 = por %p1657_p9, %p1656_p8 }
  0x51   :  { %p1659_p11 = pnand %p1658_p10, %p1652_p7 }
  0x53   :  { %1662 = shalt.err (!%p1659_p11)
}
  0x54   :  { %83 = dma.hbm_to_vmem [thread:$0]  %s1900_s7, 1024, %s78_s12, [#allocation9], %s1694_s19, %s1694_s19, %s1695_s20  }
  0x55   :  { %1685 = dma.done.wait [#allocation3], 896  }
  0x56   :  { %1686 = vsyncadd [#allocation3], 4294966400 }
  0x57   :  { %1687 = dma.done.wait [#allocation6], 8192  }
  0x58   :  { %1688 = vsyncadd [#allocation6], 4294959104 }
  0x59   :  { %1689 = dma.done.wait [#allocation9], 2048  }
  0x5a   :  { %1690 = vsyncadd [#allocation9], 4294965248  ;;  %v1443_v0 = vld [vmem:[#allocation5 + $0x40] sm:$0xff]   ;;  %v1447_v4 = vld [vmem:[#allocation5 + $0x48] sm:$0xff]   ;;  %v1702_v38 = vmov 0.0   ;;  %vm1703_vm0 = vmmov 0  }
  0x5b   :  { %v1444_v1 = vld [vmem:[#allocation5] sm:$0xff]   ;;  %1247 = vmatprep.subr.bf16.mxu0 %v1443_v0  ;;  %v1448_v5 = vld [vmem:[#allocation5 + $0x8] sm:$0xff]   ;;  %v1451_v8 = vld [vmem:[#allocation5 + $0x50] sm:$0xff]  }
  0x5c   :  { %v1445_v2 = vld [vmem:[#allocation5 + $0xc0] sm:$0xff]   ;;  %1248 = vmatpush3.bf16.msra.mxu0 %v1444_v1  ;;  %v1449_v6 = vld [vmem:[#allocation5 + $0xc8] sm:$0xff]   ;;  %v1452_v9 = vld [vmem:[#allocation5 + $0x10] sm:$0xff]  }
  0x5d   :  { %v1446_v3 = vld [vmem:[#allocation5 + $0x80] sm:$0xff]   ;;  %1269 = vmatprep.subr.bf16.mxu1 %v1445_v2  ;;  %1249 = vmatprep.subr.bf16.mxu0 %v1447_v4  ;;  %v1450_v7 = vld [vmem:[#allocation5 + $0x88] sm:$0xff]   ;;  %v1453_v10 = vld [vmem:[#allocation5 + $0xd0] sm:$0xff]  }
  0x5e   :  { %1270 = vmatpush3.bf16.msra.mxu1 %v1446_v3  ;;  %v1454_v11 = vld [vmem:[#allocation5 + $0x90] sm:$0xff]   ;;  %v1455_v12 = vld [vmem:[#allocation5 + $0x58] sm:$0xff]   ;;  %v1459_v16 = vld [vmem:[#allocation5 + $0x60] sm:$0xff]  }
  0x5f   :  { %1271 = vmatprep.subr.bf16.mxu1 %v1449_v6  ;;  %v1456_v13 = vld [vmem:[#allocation5 + $0x18] sm:$0xff]   ;;  %v1460_v17 = vld [vmem:[#allocation5 + $0x20] sm:$0xff]   ;;  %v1463_v20 = vld [vmem:[#allocation5 + $0x68] sm:$0xff]  }
  0x60   :  { %1250 = vmatpush3.bf16.msra.mxu0 %v1448_v5  ;;  %v1457_v14 = vld [vmem:[#allocation5 + $0xd8] sm:$0xff]   ;;  %v1461_v18 = vld [vmem:[#allocation5 + $0xe0] sm:$0xff]   ;;  %v1464_v21 = vld [vmem:[#allocation5 + $0x28] sm:$0xff]  }
  0x61   :  { %1251 = vmatprep.subr.bf16.mxu0 %v1451_v8  ;;  %v1458_v15 = vld [vmem:[#allocation5 + $0x98] sm:$0xff]   ;;  %v1462_v19 = vld [vmem:[#allocation5 + $0xa0] sm:$0xff]   ;;  %v1465_v22 = vld [vmem:[#allocation5 + $0xe8] sm:$0xff]  }
  0x62   :  { %1272 = vmatpush3.bf16.msra.mxu1 %v1450_v7  ;;  %v1466_v23 = vld [vmem:[#allocation5 + $0xa8] sm:$0xff]   ;;  %v1467_v24 = vld [vmem:[#allocation5 + $0x70] sm:$0xff]   ;;  %v1471_v28 = vld [vmem:[#allocation5 + $0x78] sm:$0xff]  }
  0x63   :  { %1273 = vmatprep.subr.bf16.mxu1 %v1453_v10  ;;  %v1468_v25 = vld [vmem:[#allocation5 + $0x30] sm:$0xff]   ;;  %v1472_v29 = vld [vmem:[#allocation5 + $0x38] sm:$0xff]   ;;  %v1474_v31 = vld [vmem:[#allocation2] ss:$28 sps:$4 sm:$0xff]  }
  0x64   :  { %1252 = vmatpush3.bf16.msra.mxu0 %v1452_v9  ;;  %v1469_v26 = vld [vmem:[#allocation5 + $0xf0] sm:$0xff]   ;;  %v1473_v30 = vld [vmem:[#allocation5 + $0xf8] sm:$0xff]   ;;  %v1476_v32 = vld [vmem:[#allocation2 + $0x4] ss:$28 sps:$4 sm:$0xff]  }
  0x65   :  { %1253 = vmatprep.subr.bf16.mxu0 %v1455_v12  ;;  %v1470_v27 = vld [vmem:[#allocation5 + $0xb0] sm:$0xff]   ;;  %v1477_v33 = vld [vmem:[#allocation5 + $0xb8] sm:$0xff]   ;;  %633 = vmatprep.mubr.bf16.mxu0 %v1476_v32  ;;  %v1478_v34 = vld [vmem:[#allocation5 + $0x140] sm:$0xff]  }
  0x66   :  { %1274 = vmatpush3.bf16.msra.mxu1 %v1454_v11  ;;  %v1479_v35 = vld [vmem:[#allocation2 + $0x8] ss:$28 sps:$4 sm:$0xff]   ;;  %v1482_v37 = vld [vmem:[#allocation5 + $0x100] sm:$0xff]   ;;  %v1490_v46 = vld [vmem:[#allocation5 + $0x158] sm:$0xff]  }
  0x67   :  { %1275 = vmatprep.subr.bf16.mxu1 %v1457_v14  ;;  %v1481_v36 = vld [vmem:[#allocation2 + $0xc] ss:$28 sps:$4 sm:$0xff]   ;;  %v1483_v39 = vld [vmem:[#allocation5 + $0x180] sm:$0xff]   ;;  %v1484_v40 = vld [vmem:[#allocation5 + $0x148] sm:$0xff]  }
  0x68   :  { %1254 = vmatpush3.bf16.msra.mxu0 %v1456_v13  ;;  %674 = vmatprep.mubr.bf16.mxu1 %v1481_v36  ;;  %v1485_v41 = vld [vmem:[#allocation5 + $0x108] sm:$0xff]   ;;  %v1487_v43 = vld [vmem:[#allocation5 + $0x150] sm:$0xff]   ;;  %v1491_v47 = vld [vmem:[#allocation5 + $0x118] sm:$0xff]  }
  0x69   :  { %1255 = vmatprep.subr.bf16.mxu0 %v1459_v16  ;;  %v1486_v42 = vld [vmem:[#allocation5 + $0x188] sm:$0xff]   ;;  %v1488_v44 = vld [vmem:[#allocation5 + $0x110] sm:$0xff]   ;;  %v1492_v48 = vld [vmem:[#allocation5 + $0x198] sm:$0xff]  }
  0x6a   :  { %1276 = vmatpush3.bf16.msra.mxu1 %v1458_v15  ;;  %v1489_v45 = vld [vmem:[#allocation5 + $0x190] sm:$0xff]   ;;  %v1493_v49 = vld [vmem:[#allocation5 + $0x160] sm:$0xff]   ;;  %v1496_v52 = vld [vmem:[#allocation5 + $0x168] sm:$0xff]  }
  0x6b   :  { %1277 = vmatprep.subr.bf16.mxu1 %v1461_v18  ;;  %v1494_v50 = vld [vmem:[#allocation5 + $0x120] sm:$0xff]   ;;  %v1497_v53 = vld [vmem:[#allocation5 + $0x128] sm:$0xff]   ;;  %v1499_v55 = vld [vmem:[#allocation5 + $0x170] sm:$0xff]  }
  0x6c   :  { %1256 = vmatpush3.bf16.msra.mxu0 %v1460_v17  ;;  %v1495_v51 = vld [vmem:[#allocation5 + $0x1a0] sm:$0xff]   ;;  %v1498_v54 = vld [vmem:[#allocation5 + $0x1a8] sm:$0xff]   ;;  %v1500_v56 = vld [vmem:[#allocation5 + $0x130] sm:$0xff]  }
  0x6d   :  { %1257 = vmatprep.subr.bf16.mxu0 %v1463_v20  ;;  %v1501_v57 = vld [vmem:[#allocation5 + $0x1b0] sm:$0xff]   ;;  %v1506_v58 = vld [vmem:[#allocation2 + $0x14] ss:$28 sps:$4 sm:$0xff]   ;;  %v1509_v0 = vld [vmem:[#allocation7] sm:$0xff]  }
  0x6e   :  { %1278 = vmatpush3.bf16.msra.mxu1 %v1462_v19  ;;  %v1502_v59 = vld [vmem:[#allocation5 + $0x178] sm:$0xff]   ;;  %v1510_v1 = vld [vmem:[#allocation7 + $0x8] sm:$0xff]   ;;  %v1511_v2 = vld [vmem:[#allocation7 + $0x10] sm:$0xff]  }
  0x6f   :  { %1279 = vmatprep.subr.bf16.mxu1 %v1465_v22  ;;  %v1503_v60 = vld [vmem:[#allocation5 + $0x138] sm:$0xff]   ;;  %v1513_v4 = vld [vmem:[#allocation7 + $0x20] sm:$0xff]   ;;  %v1514_v5 = vld [vmem:[#allocation7 + $0x28] sm:$0xff]  }
  0x70   :  { %1258 = vmatpush3.bf16.msra.mxu0 %v1464_v21  ;;  %v1507_v61 = vld [vmem:[#allocation5 + $0x1b8] sm:$0xff]   ;;  %v1515_v6 = vld [vmem:[#allocation7 + $0x30] sm:$0xff]   ;;  %v1517_v8 = vld [vmem:[#allocation8] sm:$0xff]  }
  0x71   :  { %1259 = vmatprep.subr.bf16.mxu0 %v1467_v24  ;;  %v1504_v62 = vld [vmem:[#allocation2 + $0x10] ss:$28 sps:$4 sm:$0xff]   ;;  %v1508_v63 = vld [vmem:[#allocation2 + $0x18] ss:$28 sps:$4 sm:$0xff]   ;;  %v1518_v9 = vld [vmem:[#allocation8 + $0x8] sm:$0xff]  }
  0x72   :  { %1280 = vmatpush3.bf16.msra.mxu1 %v1466_v23  ;;  %v1512_v3 = vld [vmem:[#allocation7 + $0x18] sm:$0xff]   ;;  %v1519_v10 = vld [vmem:[#allocation8 + $0x10] sm:$0xff]   ;;  %v1156_v13 = vld [vmem:[%s1895_s2] ss:$0 sm:$0xff] }
  0x73   :  { %1281 = vmatprep.subr.bf16.mxu1 %v1469_v26  ;;  %v1516_v7 = vld [vmem:[#allocation7 + $0x38] sm:$0xff]  }
  0x74   :  { %1260 = vmatpush3.bf16.msra.mxu0 %v1468_v25  ;;  %v1520_v11 = vld [vmem:[#allocation8 + $0x18] sm:$0xff]  }
  0x75   :  { %1261 = vmatprep.subr.bf16.mxu0 %v1471_v28 }
  0x76   :  { %1282 = vmatpush3.bf16.msra.mxu1 %v1470_v27 }
  0x77   :  { %1283 = vmatprep.subr.bf16.mxu1 %v1473_v30 }
  0x78   :  { %1262 = vmatpush3.bf16.msra.mxu0 %v1472_v29 }
  0x79   :  { %1291 = vmatprep.subr.bf16.mxu0 %v1478_v34 }
  0x7a   :  { %1284 = vmatpush3.bf16.msra.mxu1 %v1477_v33 }
  0x7b   :  { %634 = vmatmul.mubr.bf16.vlgmr.msra.gmra.mrb[0].mxu0 %v1474_v31  ;;  %1349 = vmatprep.subr.bf16.mxu1 %v1702_v38 }
  0x7c   :  { %1292 = vmatpush3.bf16.msra.mxu0 %v1482_v37  ;;  %715 = vmatprep.mubr.bf16.mxu0 %v1506_v58 }
  0x7d   :  { %675 = vmatmul.mubr.bf16.vlgmr.msra.gmra.mrb[0].mxu1 %v1479_v35  ;;  %1293 = vmatprep.subr.bf16.mxu0 %v1484_v40 }
  0x7e   :  { %1350 = vmatpush3.bf16.msra.mxu1 %v1483_v39  ;;  %1365 = vmatprep.mubr.msk.bf16.mxu1 %vm1703_vm0, %v1702_v38 }
  0x7f   :  { %1351 = vmatprep.subr.bf16.mxu1 %v1702_v38 }
  0x80   :  { %1294 = vmatpush3.bf16.msra.mxu0 %v1485_v41 }
  0x81   :  { %1295 = vmatprep.subr.bf16.mxu0 %v1487_v43 }
  0x82   :  { %1352 = vmatpush3.bf16.msra.mxu1 %v1486_v42 }
  0x83   :  { %1353 = vmatprep.subr.bf16.mxu1 %v1702_v38 }
  0x84   :  { %1296 = vmatpush3.bf16.msra.mxu0 %v1488_v44 }
  0x85   :  { %1297 = vmatprep.subr.bf16.mxu0 %v1490_v46 }
  0x86   :  { %1354 = vmatpush3.bf16.msra.mxu1 %v1489_v45 }
  0x87   :  { %1355 = vmatprep.subr.bf16.mxu1 %v1702_v38 }
  0x88   :  { %1298 = vmatpush3.bf16.msra.mxu0 %v1491_v47  ;;  %v1521_v47 = vld [vmem:[#allocation8 + $0x20] sm:$0xff]  }
  0x89   :  { %1299 = vmatprep.subr.bf16.mxu0 %v1493_v49  ;;  %v1523_v49 = vld [vmem:[#allocation8 + $0x30] sm:$0xff]  }
  0x8a   :  { %1356 = vmatpush3.bf16.msra.mxu1 %v1492_v48  ;;  %v1522_v48 = vld [vmem:[#allocation8 + $0x28] sm:$0xff]  }
  0x8b   :  { %1357 = vmatprep.subr.bf16.mxu1 %v1702_v38 }
  0x8c   :  { %1300 = vmatpush3.bf16.msra.mxu0 %v1494_v50  ;;  %v1524_v50 = vld [vmem:[#allocation8 + $0x38] sm:$0xff]  }
  0x8d   :  { %1301 = vmatprep.subr.bf16.mxu0 %v1496_v52  ;;  %v1526_v52 = vld [vmem:[#allocation10 + $0x8] sm:$0xff]  }
  0x8e   :  { %1358 = vmatpush3.bf16.msra.mxu1 %v1495_v51  ;;  %v1525_v51 = vld [vmem:[#allocation10] sm:$0xff]  }
  0x8f   :  { %1359 = vmatprep.subr.bf16.mxu1 %v1702_v38 }
  0x90   :  { %1302 = vmatpush3.bf16.msra.mxu0 %v1497_v53  ;;  %v1527_v53 = vld [vmem:[#allocation10 + $0x10] sm:$0xff]  }
  0x91   :  { %1303 = vmatprep.subr.bf16.mxu0 %v1499_v55  ;;  %v1220_v55 = vld [vmem:[%s1897_s4] ss:$0 sm:$0xff] }
  0x92   :  { %1360 = vmatpush3.bf16.msra.mxu1 %v1498_v54  ;;  %v1528_v54 = vld [vmem:[#allocation10 + $0x18] sm:$0xff]  }
  0x93   :  { %1361 = vmatprep.subr.bf16.mxu1 %v1702_v38 }
  0x94   :  { %1304 = vmatpush3.bf16.msra.mxu0 %v1500_v56 }
  0x95   :  { %1305 = vmatprep.subr.bf16.mxu0 %v1502_v59 }
  0x96   :  { %1362 = vmatpush3.bf16.msra.mxu1 %v1501_v57 }
  0x97   :  { %1363 = vmatprep.subr.bf16.mxu1 %v1702_v38 }
  0x98   :  { %1306 = vmatpush3.bf16.msra.mxu0 %v1503_v60 }
  0x99   :  { %1369 = vmatprep.subr.bf16.mxu0 %v1702_v38 }
  0x9a   :  { %1364 = vmatpush3.bf16.msra.mxu1 %v1507_v61 }
  0x9b   :  { %1389 = vmatprep.subr.bf16.mxu1 %v1702_v38  ;;  %716 = vmatmul.mubr.bf16.vlgmr.msra.gmra.mrb[4].mxu0 %v1504_v62 }
  0x9c   :  { %1385 = vmatprep.mubr.msk.bf16.mxu0 %vm1703_vm0, %v1702_v38  ;;  %1370 = vmatpush3.bf16.msra.mxu0 %v1509_v0 }
  0x9d   :  { %1366 = vmatmul.mubr.bf16.vlgmr.msra.gmra.mrb[4].mxu1 %v1508_v63  ;;  %1371 = vmatprep.subr.bf16.mxu0 %v1702_v38 }
  0x9e   :  { %1405 = vmatprep.mubr.msk.bf16.mxu1 %vm1703_vm0, %v1702_v38  ;;  %1390 = vmatpush3.bf16.msra.mxu1 %v1517_v8 }
  0x9f   :  { %1391 = vmatprep.subr.bf16.mxu1 %v1702_v38 }
  0xa0   :  { %1372 = vmatpush3.bf16.msra.mxu0 %v1510_v1  ;;  %v1529_v1 = vld [vmem:[#allocation10 + $0x20] sm:$0xff]  }
  0xa1   :  { %1373 = vmatprep.subr.bf16.mxu0 %v1702_v38 }
  0xa2   :  { %1392 = vmatpush3.bf16.msra.mxu1 %v1518_v9 }
  0xa3   :  { %1393 = vmatprep.subr.bf16.mxu1 %v1702_v38 }
  0xa4   :  { %1374 = vmatpush3.bf16.msra.mxu0 %v1511_v2  ;;  %v1530_v2 = vld [vmem:[#allocation10 + $0x28] sm:$0xff]  }
  0xa5   :  { %1375 = vmatprep.subr.bf16.mxu0 %v1702_v38 }
  0xa6   :  { %1394 = vmatpush3.bf16.msra.mxu1 %v1519_v10 }
  0xa7   :  { %1395 = vmatprep.subr.bf16.mxu1 %v1702_v38 }
  0xa8   :  { %1376 = vmatpush3.bf16.msra.mxu0 %v1512_v3  ;;  %v1531_v3 = vld [vmem:[#allocation10 + $0x30] sm:$0xff]  }
  0xa9   :  { %1377 = vmatprep.subr.bf16.mxu0 %v1702_v38 }
  0xaa   :  { %1396 = vmatpush3.bf16.msra.mxu1 %v1520_v11 }
  0xab   :  { %1397 = vmatprep.subr.bf16.mxu1 %v1702_v38 }
  0xac   :  { %1378 = vmatpush3.bf16.msra.mxu0 %v1513_v4  ;;  %v1532_v4 = vld [vmem:[#allocation10 + $0x38] sm:$0xff]  }
  0xad   :  { %1379 = vmatprep.subr.bf16.mxu0 %v1702_v38 }
  0xae   :  { %1398 = vmatpush3.bf16.msra.mxu1 %v1521_v47 }
  0xaf   :  { %1399 = vmatprep.subr.bf16.mxu1 %v1702_v38 }
  0xb0   :  { %1380 = vmatpush3.bf16.msra.mxu0 %v1514_v5  ;;  %v1229_v5 = vld [vmem:[%s1899_s6] ss:$0 sm:$0xff]  ;;  %s1704_s6 = smov [#allocation11]  }
  0xb1   :  { %1381 = vmatprep.subr.bf16.mxu0 %v1702_v38 }
  0xb2   :  { %1400 = vmatpush3.bf16.msra.mxu1 %v1522_v48 }
  0xb3   :  { %1401 = vmatprep.subr.bf16.mxu1 %v1702_v38 }
  0xb4   :  { %1382 = vmatpush3.bf16.msra.mxu0 %v1515_v6 }
  0xb5   :  { %1383 = vmatprep.subr.bf16.mxu0 %v1702_v38 }
  0xb6   :  { %1402 = vmatpush3.bf16.msra.mxu1 %v1523_v49 }
  0xb7   :  { %1403 = vmatprep.subr.bf16.mxu1 %v1702_v38 }
  0xb8   :  { %1384 = vmatpush3.bf16.msra.mxu0 %v1516_v7 }
  0xb9   :  { %1409 = vmatprep.subr.bf16.mxu0 %v1702_v38 }
  0xba   :  { %1404 = vmatpush3.bf16.msra.mxu1 %v1524_v50 }
 0x14e   :  { %v1263_v12 = vpop.f32.mrb[0].mxu0 }
 0x14f   :  { %v1264_v14 = vpop.f32.mrb[1].mxu0 }
 0x150   :  { %v1265_v15 = vadd.f32 %v1264_v14, %v1263_v12  ;;  %v1266_v16 = vpop.f32.mrb[2].mxu0  ;;  %v1285_v17 = vpop.f32.mrb[0].mxu1 }
 0x151   :  { %v1267_v18 = vpop.f32.mrb[3].mxu0  ;;  %v1286_v21 = vpop.f32.mrb[1].mxu1 }
 0x152   :  { %v636_v19 = vadd.f32 %v1265_v15, %v1156_v13  ;;  %v1268_v20 = vadd.f32 %v1267_v18, %v1266_v16  ;;  %v1287_v22 = vadd.f32 %v1286_v21, %v1285_v17  ;;  %v1288_v23 = vpop.f32.mrb[2].mxu1  ;;  %v1110_v15 = vlaneseq }
 0x153   :  { %v1289_v25 = vpop.f32.mrb[3].mxu1 }
 0x154   :  { %v639_v24 = vadd.f32 %v1268_v20, %v1156_v13  ;;  %v677_v26 = vadd.f32 %v1287_v22, %v636_v19  ;;  %v1290_v27 = vadd.f32 %v1289_v25, %v1288_v23  ;;  %v1111_v16 = vand.u32 127, %v1110_v15 }
 0x156   :  { %v680_v28 = vadd.f32 %v1290_v27, %v639_v24  ;;  %vm1112_vm1 = vcmp.lt.s32.totalorder %v1111_v16, 10 }
 0x16e   :  { %v1307_v29 = vpop.f32.mrb[4].mxu0 }
 0x16f   :  { %v1308_v30 = vpop.f32.mrb[5].mxu0 }
 0x170   :  { %v758_v31 = vpop.f32.mrb[4].mxu1  ;;  %v1309_v32 = vadd.f32 %v1308_v30, %v1307_v29  ;;  %v1310_v33 = vpop.f32.mrb[6].mxu0 }
 0x171   :  { %v1367_v34 = vpop.f32.mrb[5].mxu1  ;;  %v1311_v35 = vpop.f32.mrb[7].mxu0 }
 0x172   :  { %v761_v36 = vpop.f32.mrb[6].mxu1  ;;  %v718_v37 = vadd.f32 %v1309_v32, %v677_v26  ;;  %v1312_v39 = vadd.f32 %v1311_v35, %v1310_v33 }
 0x173   :  { %v1368_v40 = vpop.f32.mrb[7].mxu1 }
 0x174   :  { %v759_v41 = vadd.f32 %v758_v31, %v718_v37  ;;  %v721_v42 = vadd.f32 %v1312_v39, %v680_v28 }
 0x176   :  { %v762_v43 = vadd.f32 %v761_v36, %v721_v42  ;;  %1533 = vtanh.f32 %v759_v41 }
 0x178   :  { %1535 = vtanh.f32 %v762_v43 }
 0x180   :  { %v1534_v44 = vpop.eup %1533 }
 0x182   :  { %v1536_v45 = vpop.eup %1535 }
 0x183   :  { %v767_v46 = vpack.c.bf16 %v1536_v45, %v1534_v44 }
 0x185   :  { %1386 = vmatmul.mubr.bf16.vlgmr.msra.gmra.mrb[8].mxu0 %v767_v46 }
 0x186   :  { %1425 = vmatprep.mubr.msk.bf16.mxu0 %vm1703_vm0, %v1702_v38  ;;  %1410 = vmatpush3.bf16.msra.mxu0 %v1525_v51 }
 0x187   :  { %1411 = vmatprep.subr.bf16.mxu0 %v1702_v38 }
 0x18a   :  { %1412 = vmatpush3.bf16.msra.mxu0 %v1526_v52 }
 0x18b   :  { %1413 = vmatprep.subr.bf16.mxu0 %v1702_v38 }
 0x18e   :  { %1414 = vmatpush3.bf16.msra.mxu0 %v1527_v53 }
 0x18f   :  { %1415 = vmatprep.subr.bf16.mxu0 %v1702_v38 }
 0x192   :  { %1416 = vmatpush3.bf16.msra.mxu0 %v1528_v54 }
 0x193   :  { %1417 = vmatprep.subr.bf16.mxu0 %v1702_v38 }
 0x196   :  { %1418 = vmatpush3.bf16.msra.mxu0 %v1529_v1 }
 0x197   :  { %1419 = vmatprep.subr.bf16.mxu0 %v1702_v38 }
 0x19a   :  { %1420 = vmatpush3.bf16.msra.mxu0 %v1530_v2 }
 0x19b   :  { %1421 = vmatprep.subr.bf16.mxu0 %v1702_v38 }
 0x19e   :  { %1422 = vmatpush3.bf16.msra.mxu0 %v1531_v3 }
 0x19f   :  { %1423 = vmatprep.subr.bf16.mxu0 %v1702_v38  ;;  %v1238_v38 = vld [vmem:[%s1901_s8] ss:$0 sm:$0xff]  ;;  %s1142_s8 = sshll.u32 %s1704_s6, 4  ;;  %s1143_s8 = int_to_ptr.vmem [resolvable:$true] %s1142_s8 }
 0x1a0   :  { %s1663_s13 = scalar_lea.vmem %s1143_s8, 256  ;;  %p1668_p13 = scmp.lt.s32.totalorder %s1143_s8, %s1143_s8 }
 0x1a1   :  { %p1664_p12 = scmp.ne.s32.totalorder %s1143_s8, %s1663_s13  ;;  %p1669_p0 = scmp.lt.s32.totalorder %s1663_s13, %s1663_s13 }
 0x1a2   :  { %1424 = vmatpush3.bf16.msra.mxu0 %v1532_v4 }
 0x1a3   :  { %p1670_p1 = por %p1669_p0, %p1668_p13 }
 0x1a5   :  { %p1671_p2 = pnand %p1670_p1, %p1664_p12 }
 0x258   :  { %v873_v56 = vpop.f32.mrb[8].mxu0 }
 0x259   :  { %v874_v57 = vadd.f32 %v1220_v55, %v873_v56  ;;  %v1387_v58 = vpop.f32.mrb[9].mxu0 }
 0x25a   :  { %v876_v59 = vpop.f32.mrb[10].mxu0 }
 0x25b   :  { %v877_v60 = vadd.f32 %v1220_v55, %v876_v59  ;;  %v1388_v61 = vpop.f32.mrb[11].mxu0  ;;  %1537 = vtanh.f32 %v874_v57 }
 0x25d   :  { %1539 = vtanh.f32 %v877_v60 }
 0x265   :  { %v1538_v62 = vpop.eup %1537 }
 0x267   :  { %v1540_v63 = vpop.eup %1539 }
 0x268   :  { %v882_v0 = vpack.c.bf16 %v1540_v63, %v1538_v62 }
 0x26a   :  { %1406 = vmatmul.mubr.bf16.vlgmr.msra.gmra.mrb[8].mxu1 %v882_v0 }
 0x33d   :  { %v988_v6 = vpop.f32.mrb[8].mxu1 }
 0x33e   :  { %v989_v7 = vadd.f32 %v1229_v5, %v988_v6  ;;  %v1407_v8 = vpop.f32.mrb[9].mxu1 }
 0x33f   :  { %v991_v9 = vpop.f32.mrb[10].mxu1 }
 0x340   :  { %v992_v10 = vadd.f32 %v1229_v5, %v991_v9  ;;  %v1408_v11 = vpop.f32.mrb[11].mxu1  ;;  %1541 = vtanh.f32 %v989_v7 }
 0x342   :  { %1543 = vtanh.f32 %v992_v10 }
 0x34a   :  { %v1542_v12 = vpop.eup %1541 }
 0x34c   :  { %v1544_v13 = vpop.eup %1543 }
 0x34d   :  { %v997_v14 = vpack.c.bf16 %v1544_v13, %v1542_v12 }
 0x34f   :  { %1426 = vmatmul.mubr.bf16.vlgmr.msra.gmra.mrb[12].mxu0 %v997_v14 }
 0x422   :  { %v1103_v17 = vpop.f32.mrb[12].mxu0 }
 0x423   :  { %v1104_v18 = vadd.f32 %v1238_v38, %v1103_v17  ;;  %v1427_v19 = vpop.f32.mrb[13].mxu0 }
 0x424   :  { %v1106_v20 = vpop.f32.mrb[14].mxu0 }
 0x425   :  { %v1107_v21 = vadd.f32 %v1238_v38, %v1106_v20  ;;  %v1428_v22 = vpop.f32.mrb[15].mxu0  ;;  %v1113_v23 = vsel %vm1112_vm1, %v1104_v18, -1e+30 }
 0x426   :  { %1115 = vmax.xlane.f32.xlu0 %v1113_v23 }
 0x427   :  { %v1114_v24 = vsel %vm1112_vm1, %v1107_v21, -1e+30 }
 0x42a   :  { %1117 = vmax.xlane.f32.xlu0 %v1114_v24 }
 0x4b3   :  { %v1116_v25 = vpop.xlane.xlu0 %1115 }
 0x4b4   :  { %v1119_v26 = vsub.f32 %v1113_v23, %v1116_v25 }
 0x4b6   :  { %v1121_v27 = vmul.f32 1.442695, %v1119_v26 }
 0x4b7   :  { %v1118_v28 = vpop.xlane.xlu0 %1117 }
 0x4b8   :  { %v1120_v29 = vsub.f32 %v1114_v24, %v1118_v28  ;;  %1545 = vpow2.f32 %v1121_v27 }
 0x4ba   :  { %v1123_v30 = vmul.f32 1.442695, %v1120_v29 }
 0x4bc   :  { %1547 = vpow2.f32 %v1123_v30 }
 0x4c2   :  { %v1546_v31 = vpop.eup %1545 }
 0x4c3   :  { %1125 = vadd.xlane.f32.xlu1 %v1546_v31 }
 0x4c6   :  { %v1548_v32 = vpop.eup %1547 }
 0x4c7   :  { %1127 = vadd.xlane.f32.xlu1 %v1548_v32 }
 0x550   :  { %v1126_v33 = vpop.xlane.xlu1 %1125 }
 0x551   :  { %1549 = vlog2.f32 %v1126_v33 }
 0x554   :  { %v1128_v34 = vpop.xlane.xlu1 %1127 }
 0x555   :  { %1551 = vlog2.f32 %v1128_v34 }
 0x55b   :  { %v1550_v35 = vpop.eup %1549 }
 0x55c   :  { %v1130_v36 = vmul.f32 0.6931472, %v1550_v35 }
 0x55e   :  { %v1133_v37 = vsub.f32 %v1119_v26, %v1130_v36 }
 0x55f   :  { %v1552_v39 = vpop.eup %1551 }
 0x560   :  { %1135 = vst [vmem:[#allocation11] sm:$0xff] %v1133_v37  ;;  %v1132_v40 = vmul.f32 0.6931472, %v1552_v39 }
 0x562   :  { %v1134_v41 = vsub.f32 %v1120_v29, %v1132_v40 }
 0x564   :  { %1136 = vst [vmem:[#allocation11 + $0x8] sm:$0xff] %v1134_v41 }
 0x565   :  { %1674 = shalt.err (!%p1671_p2)
}
 0x566   :  { %s1675_s14 = scalar_lea.hbm %s1902_s9, 256 }
 0x567   :  { %p1676_p3 = scmp.ne.s32.totalorder %s1902_s9, %s1675_s14  ;;  %p1679_p4 = scmp.lt.u32.totalorder %s1675_s14, %s1902_s9 }
 0x569   :  { %p1681_p5 = pnand %p1679_p4, %p1676_p3 }
 0x56b   :  { %1684 = shalt.err (!%p1681_p5)
}
 0x56c   :  { %s1705_s26 = smov 128   ;;  %s1706_s18 = smov 8  }
 0x56d   :  { %1148 = dma.vmem_to_hbm [thread:$0]  %s1143_s8, 256, %s1902_s9, [#allocation4], %s1705_s26, %s1705_s26, %s1706_s18  }
 0x56e   :  { %1691 = dma.done.wait [#allocation4], 256  }
 0x56f   :  { %1692 = vsyncadd [#allocation4], 4294967040 }
 0x570   :  { %1152 = vsyncpa [#allocation3], 1 }
 0x571   :  { %1153 = vsyncpa [#allocation6], 1 }
 0x572   :  { %1154 = vsyncpa [#allocation9], 1 }
 0x573   :  { %1155 = vsyncpa [#allocation4], 1 }

</bundles_post_ra>
